<compile_context>
chip_gen: v7x
topology: tpu7x:2x2x1
jax: 0.10.0
libtpu: 0.0.40
codegen_flags: <defaults>
</compile_context>

<pallas_src>
import jax
import jax.numpy as jnp
from jax.experimental import pallas as pl
from jax.experimental.pallas import tpu as pltpu

IN = 28 * 28          # 784
HID = 20
OUT = 10
H_PAD = 128           # hidden padded to one full lane row
O_PAD = 128           # output padded to one full lane row
TB_MAX = 2048         # batch tile cap (f32 x: ~6.4 MiB/tile, double-buffered)


def _round_up(n, m):
    return ((n + m - 1) // m) * m


def _choose_batch_tile(B):
    """Batch tile: >=2 tiles for v7x megacore when B is big enough, capped at TB_MAX."""
    if B <= 16:
        return B                      # single full-extent block (allowed: equals array dim)
    half = -(-B // 2)                 # ceil(B / 2)
    return max(8, min(TB_MAX, _round_up(half, 8)))


def mlp2_kernel(x_ref, w1_ref, b1_ref, w2_ref, b2_ref, o_ref):
    # x_ref: (TB, 784) native dtype   w1_ref: (784, 128)  b1_ref: (1, 128) f32
    # w2_ref: (128, 128)              b2_ref: (1, 128) f32   o_ref: (TB, 128)
    # In-kernel cast to the weight operand dtype (free on the VPU; avoids a
    # wrapper-side astype that would double x's HBM traffic).
    x = x_ref[...].astype(w1_ref.dtype)
    # fc1 on the MXU -> f32 accumulate; bias + ReLU in f32.
    h = jnp.dot(x, w1_ref[...], preferred_element_type=jnp.float32) + b1_ref[...]
    h = jnp.maximum(h, 0.0)
    # fc2 on the MXU; cast activations to the weight operand dtype (no-op for f32).
    out = jnp.dot(h.astype(w2_ref.dtype), w2_ref[...],
                  preferred_element_type=jnp.float32) + b2_ref[...]
    o_ref[...] = out.astype(o_ref.dtype)


def prepare_params(params, compute_dtype=jnp.bfloat16):
    """One-time prep: transpose to (in, out), zero-pad lanes to 128, cast operands."""
    w1, b1, w2, b2 = params  # w1: (20,784) b1: (20,) w2: (10,20) b2: (10,)
    w1_t = jnp.transpose(w1).astype(compute_dtype)       # (784, 20)
    w2_t = jnp.transpose(w2).astype(compute_dtype)       # (20, 10)
    w1_p = jnp.zeros((IN, H_PAD), compute_dtype).at[:, :HID].set(w1_t)
    w2_p = jnp.zeros((H_PAD, O_PAD), compute_dtype).at[:HID, :OUT].set(w2_t)
    # Biases stay f32 (bias-add / ReLU in f32 on every generation).
    b1_p = jnp.zeros((1, H_PAD), jnp.float32).at[:, :HID].set(b1.astype(jnp.float32))
    b2_p = jnp.zeros((1, O_PAD), jnp.float32).at[:, :OUT].set(b2.astype(jnp.float32))
    return w1_p, b1_p, w2_p, b2_p


def mnist_2mlp_forward(x_nchw, prepared, out_dtype=jnp.float32):
    w1_p, b1_p, w2_p, b2_p = prepared
    B = x_nchw.shape[0]

    # inputs.view(-1, 784); keep native dtype — the bf16 cast (if any) happens
    # inside the kernel so x is read from HBM exactly once.
    x = x_nchw.reshape(B, IN)
    if x.dtype not in (jnp.float32, jnp.bfloat16):
        x = x.astype(jnp.float32)

    tb = _choose_batch_tile(B)
    grid = (pl.cdiv(B, tb),)   # last partial block handled by Pallas OOB masking

    x_item = jnp.dtype(x.dtype).itemsize
    w_item = jnp.dtype(w1_p.dtype).itemsize
    o_item = jnp.dtype(out_dtype).itemsize

    # Scoped-VMEM budget: double-buffered x + out tiles, weights/biases (count
    # their buffers conservatively as double too), plus a small margin.
    vmem_bytes = (2 * tb * IN * x_item
                  + 2 * tb * O_PAD * o_item
                  + 2 * (IN * H_PAD + H_PAD * O_PAD) * w_item
                  + 2 * (H_PAD + O_PAD) * 4)
    vmem_limit = max(16 << 20, min(48 << 20, int(vmem_bytes) + (4 << 20)))

    cost = pl.CostEstimate(
        flops=2 * B * (IN * H_PAD + H_PAD * O_PAD),
        transcendentals=0,
        bytes_accessed=(B * IN * x_item
                        + (IN * H_PAD + H_PAD * O_PAD) * w_item
                        + (H_PAD + O_PAD) * 4
                        + B * O_PAD * o_item),
    )

    out_padded = pl.pallas_call(
        mlp2_kernel,
        out_shape=jax.ShapeDtypeStruct((B, O_PAD), out_dtype),
        grid=grid,
        in_specs=[
            pl.BlockSpec((tb, IN), lambda i: (i, 0)),        # x: streamed per batch tile
            pl.BlockSpec((IN, H_PAD), lambda i: (0, 0)),     # w1: VMEM-resident
            pl.BlockSpec((1, H_PAD), lambda i: (0, 0)),      # b1
            pl.BlockSpec((H_PAD, O_PAD), lambda i: (0, 0)),  # w2
            pl.BlockSpec((1, O_PAD), lambda i: (0, 0)),      # b2
        ],
        out_specs=pl.BlockSpec((tb, O_PAD), lambda i: (i, 0)),
        compiler_params=pltpu.CompilerParams(
            dimension_semantics=("parallel",),               # megacore on v7x
            vmem_limit_bytes=vmem_limit,
        ),
        cost_estimate=cost,
    )(x, w1_p, b1_p, w2_p, b2_p)

    return out_padded[:, :OUT]


def init_params(key):
    # PyTorch nn.Linear shapes: fc1 W (20,784), b (20,); fc2 W (10,20), b (10,)
    k1, k2, k3, k4 = jax.random.split(key, 4)
    bound1 = 1.0 / jnp.sqrt(784.0)
    bound2 = 1.0 / jnp.sqrt(20.0)
    w1 = jax.random.uniform(k1, (HID, IN), jnp.float32, -bound1, bound1)
    b1 = jax.random.uniform(k2, (HID,), jnp.float32, -bound1, bound1)
    w2 = jax.random.uniform(k3, (OUT, HID), jnp.float32, -bound2, bound2)
    b2 = jax.random.uniform(k4, (OUT,), jnp.float32, -bound2, bound2)
    return (w1, b1, w2, b2)


def reference_forward(x_nchw, params):
    w1, b1, w2, b2 = params
    x = x_nchw.reshape(x_nchw.shape[0], -1).astype(jnp.float32)
    h = jnp.maximum(x @ w1.T + b1, 0.0)
    return h @ w2.T + b2


if __name__ == "__main__":
    key = jax.random.PRNGKey(0)
    kx, kp = jax.random.split(key)
    # MNIST-like NCHW input at small batch.
    x = jax.random.normal(kx, (2, 1, 28, 28), jnp.float32)
    params = init_params(kp)
    ref = reference_forward(x, params)

    # f32 operand path: tight check.
    prep_f32 = prepare_params(params, jnp.float32)
    out = jax.block_until_ready(mnist_2mlp_forward(x, prep_f32))
    assert out.shape == (2, 10), out.shape
    assert jnp.allclose(out, ref, atol=1e-4, rtol=1e-4), "f32 mismatch vs reference"

    # bf16 operand path (default; x cast in-kernel, f32 accumulation): loose check.
    prep_bf16 = prepare_params(params)  # bf16 default
    out_bf16 = jax.block_until_ready(mnist_2mlp_forward(x, prep_bf16))
    assert out_bf16.shape == (2, 10), out_bf16.shape
    assert jnp.allclose(out_bf16, ref, atol=5e-2, rtol=5e-2), "bf16 mismatch vs reference"

    # Larger, non-divisible batch exercising the partial-last-block path (no jnp.pad).
    xb = jax.random.normal(kx, (100, 1, 28, 28), jnp.float32)
    out_big = jax.block_until_ready(mnist_2mlp_forward(xb, prep_f32))
    assert out_big.shape == (100, 10), out_big.shape
    assert jnp.allclose(out_big, reference_forward(xb, params), atol=1e-4, rtol=1e-4), \
        "partial-block mismatch vs reference"

    print("KERNEL_OK")
</pallas_src>

<mosaic_0001>
module attributes {stable_mosaic.version = 11 : i64} {
  func.func @mlp2_kernel(%arg0: i32, %arg1: memref<2x784xf32, #tpu.memory_space<vmem>>, %arg2: memref<784x128xf32, #tpu.memory_space<vmem>>, %arg3: memref<1x128xf32, #tpu.memory_space<vmem>>, %arg4: memref<128x128xf32, #tpu.memory_space<vmem>>, %arg5: memref<1x128xf32, #tpu.memory_space<vmem>>, %arg6: memref<2x128xf32, #tpu.memory_space<vmem>>) attributes {dimension_semantics = [#tpu.dimension_semantics<parallel>], iteration_bounds = array<i64: 1>, scalar_prefetch = 0 : i64, scratch_operands = 0 : i64, tpu.core_type = #tpu.core_type<tc>, window_params = [{transform_indices = @transform_0, window_bounds = array<i64: 2, 784>}, {pipeline_mode = #tpu.pipeline_mode<synchronous>, transform_indices = @transform_1, window_bounds = array<i64: 784, 128>}, {pipeline_mode = #tpu.pipeline_mode<synchronous>, transform_indices = @transform_2, window_bounds = array<i64: 1, 128>}, {pipeline_mode = #tpu.pipeline_mode<synchronous>, transform_indices = @transform_3, window_bounds = array<i64: 128, 128>}, {pipeline_mode = #tpu.pipeline_mode<synchronous>, transform_indices = @transform_4, window_bounds = array<i64: 1, 128>}, {transform_indices = @transform_5, window_bounds = array<i64: 2, 128>}]} {
    %c0 = arith.constant 0 : index
    %c0_0 = arith.constant 0 : index
    %0 = vector.load %arg1[%c0, %c0_0] : memref<2x784xf32, #tpu.memory_space<vmem>>, vector<2x784xf32>
    %c0_1 = arith.constant 0 : index
    %c0_2 = arith.constant 0 : index
    %1 = vector.load %arg2[%c0_1, %c0_2] : memref<784x128xf32, #tpu.memory_space<vmem>>, vector<784x128xf32>
    %cst = arith.constant dense<0.000000e+00> : vector<2x128xf32>
    %2 = tpu.matmul %0, %1, %cst {dimension_numbers = #tpu.dot_dimension_numbers<[1], [0], [0], [1], [0, 0, 1, 1], [], []>} : vector<2x784xf32>, vector<784x128xf32>, vector<2x128xf32> -> vector<2x128xf32>
    %c0_3 = arith.constant 0 : index
    %c0_4 = arith.constant 0 : index
    %3 = vector.load %arg3[%c0_3, %c0_4] : memref<1x128xf32, #tpu.memory_space<vmem>>, vector<1x128xf32>
    %4 = vector.broadcast %3 : vector<1x128xf32> to vector<2x128xf32>
    %5 = arith.addf %2, %4 : vector<2x128xf32>
    %cst_5 = arith.constant 0.000000e+00 : f32
    %6 = vector.broadcast %cst_5 : f32 to vector<2x128xf32>
    %7 = arith.maximumf %5, %6 : vector<2x128xf32>
    %c0_6 = arith.constant 0 : index
    %c0_7 = arith.constant 0 : index
    %8 = vector.load %arg4[%c0_6, %c0_7] : memref<128x128xf32, #tpu.memory_space<vmem>>, vector<128x128xf32>
    %cst_8 = arith.constant dense<0.000000e+00> : vector<2x128xf32>
    %9 = tpu.matmul %7, %8, %cst_8 {dimension_numbers = #tpu.dot_dimension_numbers<[1], [0], [0], [1], [0, 0, 1, 1], [], []>} : vector<2x128xf32>, vector<128x128xf32>, vector<2x128xf32> -> vector<2x128xf32>
    %c0_9 = arith.constant 0 : index
    %c0_10 = arith.constant 0 : index
    %10 = vector.load %arg5[%c0_9, %c0_10] : memref<1x128xf32, #tpu.memory_space<vmem>>, vector<1x128xf32>
    %11 = vector.broadcast %10 : vector<1x128xf32> to vector<2x128xf32>
    %12 = arith.addf %9, %11 : vector<2x128xf32>
    %c0_11 = arith.constant 0 : index
    %c0_12 = arith.constant 0 : index
    %13 = vector.load %arg6[%c0_11, %c0_12] : memref<2x128xf32, #tpu.memory_space<vmem>>, vector<2x128xf32>
    tpu.vector_store %arg6[%c0_11, %c0_12], %12 {strides = array<i32>} : memref<2x128xf32, #tpu.memory_space<vmem>>, vector<2x128xf32>,
    return
  }
  func.func @transform_0(%arg0: i32) -> (i32, i32) {
    %c0_i32 = arith.constant 0 : i32
    %c0_i32_0 = arith.constant 0 : i32
    return %arg0, %c0_i32 : i32, i32
  }
  func.func @transform_1(%arg0: i32) -> (i32, i32) {
    %c0_i32 = arith.constant 0 : i32
    %c0_i32_0 = arith.constant 0 : i32
    %c0_i32_1 = arith.constant 0 : i32
    return %c0_i32, %c0_i32_0 : i32, i32
  }
  func.func @transform_2(%arg0: i32) -> (i32, i32) {
    %c0_i32 = arith.constant 0 : i32
    %c0_i32_0 = arith.constant 0 : i32
    %c0_i32_1 = arith.constant 0 : i32
    return %c0_i32, %c0_i32_0 : i32, i32
  }
  func.func @transform_3(%arg0: i32) -> (i32, i32) {
    %c0_i32 = arith.constant 0 : i32
    %c0_i32_0 = arith.constant 0 : i32
    %c0_i32_1 = arith.constant 0 : i32
    return %c0_i32, %c0_i32_0 : i32, i32
  }
  func.func @transform_4(%arg0: i32) -> (i32, i32) {
    %c0_i32 = arith.constant 0 : i32
    %c0_i32_0 = arith.constant 0 : i32
    %c0_i32_1 = arith.constant 0 : i32
    return %c0_i32, %c0_i32_0 : i32, i32
  }
  func.func @transform_5(%arg0: i32) -> (i32, i32) {
    %c0_i32 = arith.constant 0 : i32
    %c0_i32_0 = arith.constant 0 : i32
    return %arg0, %c0_i32 : i32, i32
  }
}

</mosaic_0001>

<bundles_post_ra>
// kernel: tpu_custom_call.1
= control target key start
LH: loop header
LB: loop body
LE: loop exit
PB: predicated region body
PF: predicated region fallthrough
CT: control target
= control target key end

     0   :  { %10 = vsyncpa [#allocation3], 0  ;;  %s1121_s0 = inlined_call_operand.hbm [shape: f32[2,784], index: 0, kind: input, shape index: {}]   ;;  %s1122_s1 = inlined_call_operand.hbm [shape: f32[784,128], index: 1, kind: input, shape index: {}]   ;;  %s1123_s2 = inlined_call_operand.vmem [shape: f32[1,128], index: 2, kind: input, shape index: {}]   ;;  %s1124_s3 = inlined_call_operand.hbm [shape: f32[128,128], index: 3, kind: input, shape index: {}]   ;;  %s1125_s4 = inlined_call_operand.vmem [shape: f32[1,128], index: 4, kind: input, shape index: {}]   ;;  %s1126_s5 = inlined_call_operand.hbm [shape: f32[2,128], index: 5, kind: output, shape index: {}]  }
   0x1   :  { %11 = vsyncpa [#allocation6], 0 }
   0x2   :  { %12 = vsyncpa [#allocation4], 0  ;;  %s1001_s18 = smov [#allocation5]   ;;  %s907_s22 = scalar_lea.hbm %s1122_s1, 12544 }
   0x3   :  { %s28_s19 = sshll.u32 %s1001_s18, 4  ;;  %p908_p0 = scmp.ne.s32.totalorder %s1122_s1, %s907_s22  ;;  %s29_s19 = int_to_ptr.vmem [resolvable:$true] %s28_s19 }
   0x4   :  { %p911_p1 = scmp.lt.u32.totalorder %s907_s22, %s1122_s1 }
   0x6   :  { %p913_p2 = pnand %p911_p1, %p908_p0 }
   0x8   :  { %916 = shalt.err (!%p913_p2)
}
   0x9   :  { %s917_s27 = scalar_lea.vmem %s29_s19, 12544  ;;  %p922_p4 = scmp.lt.s32.totalorder %s29_s19, %s29_s19 }
   0xa   :  { %p918_p3 = scmp.ne.s32.totalorder %s29_s19, %s917_s27  ;;  %p923_p5 = scmp.lt.s32.totalorder %s917_s27, %s917_s27 }
   0xc   :  { %p924_p6 = por %p923_p5, %p922_p4 }
   0xe   :  { %p925_p7 = pnand %p924_p6, %p918_p3 }
  0x10   :  { %928 = shalt.err (!%p925_p7)
}
  0x11   :  { %s1002_s28 = smov 128   ;;  %s1003_s29 = smov 8  }
  0x12   :  { %34 = dma.hbm_to_vmem [thread:$0]  %s1122_s1, 12544, %s29_s19, [#allocation6], %s1002_s28, %s1002_s28, %s1003_s29  }
  0x13   :  { %s1004_s7 = smov [#allocation2]   ;;  %s1005_s9 = smov [#allocation7]  }
  0x14   :  { %s19_s8 = sshll.u32 %s1004_s7, 4  ;;  %s42_s10 = sshll.u32 %s1005_s9, 4  ;;  %s20_s8 = int_to_ptr.vmem [resolvable:$true] %s19_s8  ;;  %s43_s10 = int_to_ptr.vmem [resolvable:$true] %s42_s10 }
  0x15   :  { %s929_s13 = scalar_lea.hbm %s1121_s0, 224 }
  0x16   :  { %p930_p8 = scmp.ne.s32.totalorder %s1121_s0, %s929_s13  ;;  %p933_p9 = scmp.lt.u32.totalorder %s929_s13, %s1121_s0 }
  0x18   :  { %p935_p10 = pnand %p933_p9, %p930_p8 }
  0x1a   :  { %938 = shalt.err (!%p935_p10)
}
  0x1b   :  { %s939_s1 = scalar_lea.vmem %s20_s8, 224  ;;  %p944_p12 = scmp.lt.s32.totalorder %s20_s8, %s20_s8 }
  0x1c   :  { %p940_p11 = scmp.ne.s32.totalorder %s20_s8, %s939_s1  ;;  %p945_p13 = scmp.lt.s32.totalorder %s939_s1, %s939_s1 }
  0x1e   :  { %p946_p0 = por %p945_p13, %p944_p12 }
  0x20   :  { %p947_p1 = pnand %p946_p0, %p940_p11 }
  0x22   :  { %950 = shalt.err (!%p947_p1)
}
  0x23   :  { %22 = dma.hbm_to_vmem [thread:$0]  %s1121_s0, 224, %s20_s8, [#allocation3]  }
  0x24   :  { %s951_s22 = scalar_lea.hbm %s1124_s3, 2048 }
  0x25   :  { %p952_p2 = scmp.ne.s32.totalorder %s1124_s3, %s951_s22  ;;  %p955_p3 = scmp.lt.u32.totalorder %s951_s22, %s1124_s3 }
  0x27   :  { %p957_p4 = pnand %p955_p3, %p952_p2 }
  0x29   :  { %960 = shalt.err (!%p957_p4)
}
  0x2a   :  { %s961_s27 = scalar_lea.vmem %s43_s10, 2048  ;;  %p966_p6 = scmp.lt.s32.totalorder %s43_s10, %s43_s10 }
  0x2b   :  { %p962_p5 = scmp.ne.s32.totalorder %s43_s10, %s961_s27  ;;  %p967_p7 = scmp.lt.s32.totalorder %s961_s27, %s961_s27 }
  0x2d   :  { %p968_p8 = por %p967_p7, %p966_p6 }
  0x2f   :  { %p969_p9 = pnand %p968_p8, %p962_p5 }
  0x31   :  { %972 = shalt.err (!%p969_p9)
}
  0x32   :  { %48 = dma.hbm_to_vmem [thread:$0]  %s1124_s3, 2048, %s43_s10, [#allocation6], %s1002_s28, %s1002_s28, %s1003_s29  }
  0x33   :  { %995 = dma.done.wait [#allocation3], 224  }
  0x34   :  { %996 = vsyncadd [#allocation3], 4294967072 }
  0x35   :  { %997 = dma.done.wait [#allocation6], 14592  }
  0x36   :  { %998 = vsyncadd [#allocation6], 4294952704  ;;  %v78_v0 = vld [vmem:[#allocation5 + $0x80] sm:$0xff]  ;;  %v79_v1 = vld [vmem:[#allocation5 + $0x88] sm:$0xff]  ;;  %v1006_v43 = vmov 1983009808   ;;  %v173_v45 = vlaneseq }
  0x37   :  { %v62_v2 = vld [vmem:[#allocation5] sm:$0xff]  ;;  %v772_v3 = vpack.c.bf16 %v79_v1, %v78_v0  ;;  %v63_v4 = vld [vmem:[#allocation5 + $0x8] sm:$0xff]  ;;  %v80_v11 = vld [vmem:[#allocation5 + $0x90] sm:$0xff]  ;;  %v171_v44 = vunpack.c.l.s4 %v1006_v43  ;;  %vm1008_vm0 = vmmov 0   ;;  %vm208_vm1 = vcmask 130048  }
  0x38   :  { %v110_v5 = vld [vmem:[#allocation5 + $0x180] sm:$0xff]  ;;  %v111_v6 = vld [vmem:[#allocation5 + $0x188] sm:$0xff]  ;;  %v774_v7 = vpack.c.bf16 %v63_v4, %v62_v2  ;;  %v81_v13 = vld [vmem:[#allocation5 + $0x98] sm:$0xff]  ;;  %v174_v60 = vshrl.u32 %v173_v45, 7 }
  0x39   :  { %v804_v8 = vpack.c.bf16 %v111_v6, %v110_v5  ;;  %v94_v9 = vld [vmem:[#allocation5 + $0x100] sm:$0xff]  ;;  %v95_v10 = vld [vmem:[#allocation5 + $0x108] sm:$0xff]  ;;  %773 = vmatprep.subr.bf16.mxu0 %v772_v3  ;;  %v64_v14 = vld [vmem:[#allocation5 + $0x10] sm:$0xff]  ;;  %v776_v16 = vpack.c.bf16 %v81_v13, %v80_v11  ;;  %v172_v59 = vunpack.c.0.s8 %v171_v44 }
  0x3a   :  { %v806_v12 = vpack.c.bf16 %v95_v10, %v94_v9  ;;  %v65_v15 = vld [vmem:[#allocation5 + $0x18] sm:$0xff]  ;;  %775 = vmatpush3.bf16.msra.mxu0 %v774_v7  ;;  %v112_v18 = vld [vmem:[#allocation5 + $0x190] sm:$0xff]  ;;  %v82_v23 = vld [vmem:[#allocation5 + $0xa0] sm:$0xff] }
  0x3b   :  { %805 = vmatprep.subr.bf16.mxu1 %v804_v8  ;;  %v778_v17 = vpack.c.bf16 %v65_v15, %v64_v14  ;;  %v113_v19 = vld [vmem:[#allocation5 + $0x198] sm:$0xff]  ;;  %v96_v20 = vld [vmem:[#allocation5 + $0x110] sm:$0xff]  ;;  %v83_v24 = vld [vmem:[#allocation5 + $0xa8] sm:$0xff]  ;;  %777 = vmatprep.subr.bf16.mxu0 %v776_v16  ;;  %v1083_v10 = vsub.s32 %v172_v59, %v174_v60 }
  0x3c   :  { %807 = vmatpush3.bf16.msra.mxu1 %v806_v12  ;;  %v808_v21 = vpack.c.bf16 %v113_v19, %v112_v18  ;;  %v97_v22 = vld [vmem:[#allocation5 + $0x118] sm:$0xff]  ;;  %v780_v26 = vpack.c.bf16 %v83_v24, %v82_v23  ;;  %v66_v27 = vld [vmem:[#allocation5 + $0x20] sm:$0xff]  ;;  %v67_v28 = vld [vmem:[#allocation5 + $0x28] sm:$0xff] }
  0x3d   :  { %v810_v25 = vpack.c.bf16 %v97_v22, %v96_v20  ;;  %v114_v29 = vld [vmem:[#allocation5 + $0x1a0] sm:$0xff]  ;;  %v115_v30 = vld [vmem:[#allocation5 + $0x1a8] sm:$0xff]  ;;  %v782_v33 = vpack.c.bf16 %v67_v28, %v66_v27  ;;  %v84_v35 = vld [vmem:[#allocation5 + $0xb0] sm:$0xff] }
  0x3e   :  { %809 = vmatprep.subr.bf16.mxu1 %v808_v21  ;;  %v98_v31 = vld [vmem:[#allocation5 + $0x120] sm:$0xff]  ;;  %v99_v32 = vld [vmem:[#allocation5 + $0x128] sm:$0xff]  ;;  %779 = vmatpush3.bf16.msra.mxu0 %v778_v17  ;;  %v812_v34 = vpack.c.bf16 %v115_v30, %v114_v29  ;;  %v85_v36 = vld [vmem:[#allocation5 + $0xb8] sm:$0xff] }
  0x3f   :  { %v68_v37 = vld [vmem:[#allocation5 + $0x30] sm:$0xff]  ;;  %781 = vmatprep.subr.bf16.mxu0 %v780_v26  ;;  %v814_v38 = vpack.c.bf16 %v99_v32, %v98_v31  ;;  %v784_v39 = vpack.c.bf16 %v85_v36, %v84_v35  ;;  %v69_v40 = vld [vmem:[#allocation5 + $0x38] sm:$0xff]  ;;  %v86_v49 = vld [vmem:[#allocation5 + $0xc0] sm:$0xff] }
  0x40   :  { %811 = vmatpush3.bf16.msra.mxu1 %v810_v25  ;;  %v116_v41 = vld [vmem:[#allocation5 + $0x1b0] sm:$0xff]  ;;  %v117_v42 = vld [vmem:[#allocation5 + $0x1b8] sm:$0xff]  ;;  %v87_v50 = vld [vmem:[#allocation5 + $0xc8] sm:$0xff]  ;;  %v786_v51 = vpack.c.bf16 %v69_v40, %v68_v37 }
  0x41   :  { %813 = vmatprep.subr.bf16.mxu1 %v812_v34  ;;  %v816_v46 = vpack.c.bf16 %v117_v42, %v116_v41  ;;  %v100_v47 = vld [vmem:[#allocation5 + $0x130] sm:$0xff]  ;;  %v101_v48 = vld [vmem:[#allocation5 + $0x138] sm:$0xff]  ;;  %v118_v52 = vld [vmem:[#allocation5 + $0x1c0] sm:$0xff]  ;;  %v788_v55 = vpack.c.bf16 %v87_v50, %v86_v49 }
  0x42   :  { %783 = vmatpush3.bf16.msra.mxu0 %v782_v33  ;;  %v119_v53 = vld [vmem:[#allocation5 + $0x1c8] sm:$0xff]  ;;  %v818_v54 = vpack.c.bf16 %v101_v48, %v100_v47  ;;  %v70_v56 = vld [vmem:[#allocation5 + $0x40] sm:$0xff]  ;;  %v88_v63 = vld [vmem:[#allocation5 + $0xd0] sm:$0xff] }
  0x43   :  { %785 = vmatprep.subr.bf16.mxu0 %v784_v39  ;;  %v71_v57 = vld [vmem:[#allocation5 + $0x48] sm:$0xff]  ;;  %v102_v58 = vld [vmem:[#allocation5 + $0x140] sm:$0xff]  ;;  %v820_v61 = vpack.c.bf16 %v119_v53, %v118_v52  ;;  %v89_v0 = vld [vmem:[#allocation5 + $0xd8] sm:$0xff] }
  0x44   :  { %815 = vmatpush3.bf16.msra.mxu1 %v814_v38  ;;  %v103_v62 = vld [vmem:[#allocation5 + $0x148] sm:$0xff]  ;;  %v120_v1 = vld [vmem:[#allocation5 + $0x1d0] sm:$0xff]  ;;  %v121_v2 = vld [vmem:[#allocation5 + $0x1d8] sm:$0xff]  ;;  %v790_v3 = vpack.c.bf16 %v71_v57, %v70_v56  ;;  %v792_v6 = vpack.c.bf16 %v89_v0, %v88_v63 }
  0x45   :  { %817 = vmatprep.subr.bf16.mxu1 %v816_v46  ;;  %v72_v4 = vld [vmem:[#allocation5 + $0x50] sm:$0xff]  ;;  %v822_v5 = vpack.c.bf16 %v103_v62, %v102_v58  ;;  %v73_v7 = vld [vmem:[#allocation5 + $0x58] sm:$0xff]  ;;  %v824_v11 = vpack.c.bf16 %v121_v2, %v120_v1  ;;  %v90_v12 = vld [vmem:[#allocation5 + $0xe0] sm:$0xff]  ;;  %v1007_v62 = vmov 0.0|0.0  }
  0x46   :  { %787 = vmatpush3.bf16.msra.mxu0 %v786_v51  ;;  %v104_v8 = vld [vmem:[#allocation5 + $0x150] sm:$0xff]  ;;  %v105_v9 = vld [vmem:[#allocation5 + $0x158] sm:$0xff]  ;;  %v91_v13 = vld [vmem:[#allocation5 + $0xe8] sm:$0xff]  ;;  %v794_v16 = vpack.c.bf16 %v73_v7, %v72_v4 }
  0x47   :  { %789 = vmatprep.subr.bf16.mxu0 %v788_v55  ;;  %v122_v14 = vld [vmem:[#allocation5 + $0x1e0] sm:$0xff]  ;;  %v123_v15 = vld [vmem:[#allocation5 + $0x1e8] sm:$0xff]  ;;  %v826_v17 = vpack.c.bf16 %v105_v9, %v104_v8  ;;  %v60_v18 = vld [vmem:[#allocation2] sm:$0xff]  ;;  %v796_v19 = vpack.c.bf16 %v91_v13, %v90_v12  ;;  %v1009_v8 = vmov 0.0  }
  0x48   :  { %819 = vmatpush3.bf16.msra.mxu1 %v818_v54  ;;  %v74_v20 = vld [vmem:[#allocation5 + $0x60] sm:$0xff]  ;;  %v75_v21 = vld [vmem:[#allocation5 + $0x68] sm:$0xff]  ;;  %v176_v23 = vrot.slane %v60_v18, %v1083_v10  ;;  %v169_v24 = vcombine.high %v60_v18, %v60_v18  ;;  %v828_v25 = vpack.c.bf16 %v123_v15, %v122_v14  ;;  %v92_v27 = vld [vmem:[#allocation5 + $0xf0] sm:$0xff] }
  0x49   :  { %821 = vmatprep.subr.bf16.mxu1 %v820_v61  ;;  %v106_v22 = vld [vmem:[#allocation5 + $0x160] sm:$0xff]  ;;  %v107_v26 = vld [vmem:[#allocation5 + $0x168] sm:$0xff]  ;;  %v93_v28 = vld [vmem:[#allocation5 + $0xf8] sm:$0xff]  ;;  %v798_v33 = vpack.c.bf16 %v75_v21, %v74_v20 }
  0x4a   :  { %791 = vmatpush3.bf16.msra.mxu0 %v790_v3  ;;  %v124_v29 = vld [vmem:[#allocation5 + $0x1f0] sm:$0xff]  ;;  %v125_v30 = vld [vmem:[#allocation5 + $0x1f8] sm:$0xff]  ;;  %v184_v31 = vcombine.high %v176_v23, %v176_v23  ;;  %v183_v32 = vrot.slane %v169_v24, %v1083_v10  ;;  %v830_v34 = vpack.c.bf16 %v107_v26, %v106_v22  ;;  %v800_v35 = vpack.c.bf16 %v93_v28, %v92_v27  ;;  %v142_v42 = vld [vmem:[#allocation5 + $0x280] sm:$0xff] }
  0x4b   :  { %793 = vmatprep.subr.bf16.mxu0 %v792_v6  ;;  %v76_v36 = vld [vmem:[#allocation5 + $0x70] sm:$0xff]  ;;  %v77_v37 = vld [vmem:[#allocation5 + $0x78] sm:$0xff]  ;;  %v832_v40 = vpack.c.bf16 %v125_v30, %v124_v29  ;;  %v143_v43 = vld [vmem:[#allocation5 + $0x288] sm:$0xff] }
  0x4c   :  { %823 = vmatpush3.bf16.msra.mxu1 %v822_v5  ;;  %v108_v38 = vld [vmem:[#allocation5 + $0x170] sm:$0xff]  ;;  %v185_v39 = vcombine.high %v183_v32, %v183_v32  ;;  %275 = vmatprep.mubr.f32.mxu0 %v184_v31  ;;  %v109_v41 = vld [vmem:[#allocation5 + $0x178] sm:$0xff]  ;;  %v802_v44 = vpack.c.bf16 %v77_v37, %v76_v36  ;;  %v836_v46 = vpack.c.bf16 %v143_v43, %v142_v42  ;;  %v126_v47 = vld [vmem:[#allocation5 + $0x200] sm:$0xff] }
  0x4d   :  { %825 = vmatprep.subr.bf16.mxu1 %v824_v11  ;;  %v834_v45 = vpack.c.bf16 %v109_v41, %v108_v38  ;;  %v127_v48 = vld [vmem:[#allocation5 + $0x208] sm:$0xff]  ;;  %v144_v49 = vld [vmem:[#allocation5 + $0x290] sm:$0xff]  ;;  %v145_v50 = vld [vmem:[#allocation5 + $0x298] sm:$0xff] }
  0x4e   :  { %795 = vmatpush3.bf16.msra.mxu0 %v794_v16  ;;  %345 = vmatprep.mubr.f32.mxu1 %v185_v39  ;;  %v838_v51 = vpack.c.bf16 %v127_v48, %v126_v47  ;;  %v61_v52 = vld [vmem:[#allocation2 + $0x8] sm:$0x3f]  ;;  %v158_v53 = vld [vmem:[#allocation5 + $0x300] sm:$0xff]  ;;  %v840_v54 = vpack.c.bf16 %v145_v50, %v144_v49  ;;  %v128_v55 = vld [vmem:[#allocation5 + $0x210] sm:$0xff] }
  0x4f   :  { %797 = vmatprep.subr.bf16.mxu0 %v796_v19  ;;  %v129_v56 = vld [vmem:[#allocation5 + $0x218] sm:$0xff]  ;;  %v186_v57 = vcombine.high %v61_v52, %v61_v52  ;;  %v1088_v58 = vrot.slane %v61_v52, %v1083_v10  ;;  %v159_v59 = vld [vmem:[#allocation5 + $0x308] sm:$0xff]  ;;  %v146_v60 = vld [vmem:[#allocation5 + $0x2a0] sm:$0xff] }
  0x50   :  { %827 = vmatpush3.bf16.msra.mxu1 %v826_v17  ;;  %v147_v61 = vld [vmem:[#allocation5 + $0x2a8] sm:$0xff]  ;;  %v869_v63 = vpack.c.bf16 %v159_v59, %v158_v53  ;;  %v842_v1 = vpack.c.bf16 %v129_v56, %v128_v55  ;;  %v130_v3 = vld [vmem:[#allocation5 + $0x220] sm:$0xff]  ;;  %v148_v6 = vld [vmem:[#allocation5 + $0x2b0] sm:$0xff] }
  0x51   :  { %829 = vmatprep.subr.bf16.mxu1 %v828_v25  ;;  %v201_v0 = vcombine.high %v1088_v58, %v1088_v58  ;;  %v844_v2 = vpack.c.bf16 %v147_v61, %v146_v60  ;;  %v131_v4 = vld [vmem:[#allocation5 + $0x228] sm:$0xff]  ;;  %v200_v5 = vrot.slane %v186_v57, %v1083_v10  ;;  %v149_v7 = vld [vmem:[#allocation5 + $0x2b8] sm:$0xff]  ;;  %v132_v12 = vld [vmem:[#allocation5 + $0x230] sm:$0xff] }
  0x52   :  { %799 = vmatpush3.bf16.msra.mxu0 %v798_v33  ;;  %v846_v9 = vpack.c.bf16 %v131_v4, %v130_v3  ;;  %v848_v11 = vpack.c.bf16 %v149_v7, %v148_v6  ;;  %v133_v13 = vld [vmem:[#allocation5 + $0x238] sm:$0xff]  ;;  %v150_v14 = vld [vmem:[#allocation5 + $0x2c0] sm:$0xff]  ;;  %v151_v15 = vld [vmem:[#allocation5 + $0x2c8] sm:$0xff] }
  0x53   :  { %801 = vmatprep.subr.bf16.mxu0 %v800_v35  ;;  %v850_v10 = vpack.c.bf16 %v133_v13, %v132_v12  ;;  %v852_v16 = vpack.c.bf16 %v151_v15, %v150_v14  ;;  %v134_v17 = vld [vmem:[#allocation5 + $0x240] sm:$0xff]  ;;  %v135_v18 = vld [vmem:[#allocation5 + $0x248] sm:$0xff]  ;;  %v152_v19 = vld [vmem:[#allocation5 + $0x2d0] sm:$0xff] }
  0x54   :  { %831 = vmatpush3.bf16.msra.mxu1 %v830_v34  ;;  %v153_v20 = vld [vmem:[#allocation5 + $0x2d8] sm:$0xff]  ;;  %v854_v21 = vpack.c.bf16 %v135_v18, %v134_v17  ;;  %v154_v25 = vld [vmem:[#allocation5 + $0x2e0] sm:$0xff]  ;;  %v155_v26 = vld [vmem:[#allocation5 + $0x2e8] sm:$0xff] }
  0x55   :  { %833 = vmatprep.subr.bf16.mxu1 %v832_v40  ;;  %v856_v22 = vpack.c.bf16 %v153_v20, %v152_v19  ;;  %v137_v24 = vld [vmem:[#allocation5 + $0x258] sm:$0xff]  ;;  %v860_v28 = vpack.c.bf16 %v155_v26, %v154_v25  ;;  %v138_v29 = vld [vmem:[#allocation5 + $0x260] sm:$0xff]  ;;  %v139_v30 = vld [vmem:[#allocation5 + $0x268] sm:$0xff] }
  0x56   :  { %803 = vmatpush3.bf16.msra.mxu0 %v802_v44  ;;  %v156_v31 = vld [vmem:[#allocation5 + $0x2f0] sm:$0xff]  ;;  %v862_v33 = vpack.c.bf16 %v139_v30, %v138_v29  ;;  %v141_v36 = vld [vmem:[#allocation5 + $0x278] sm:$0xff]  ;;  %v494_v40 = vld [vmem:[#allocation7 + $0x10] sm:$0xff] }
  0x57   :  { %837 = vmatprep.subr.bf16.mxu0 %v836_v46  ;;  %v140_v35 = vld [vmem:[#allocation5 + $0x270] sm:$0xff]  ;;  %v493_v39 = vld [vmem:[#allocation7 + $0x8] sm:$0xff]  ;;  %v495_v42 = vld [vmem:[#allocation7 + $0x18] sm:$0xff] }
  0x58   :  { %835 = vmatpush3.bf16.msra.mxu1 %v834_v45  ;;  %v866_v37 = vpack.c.bf16 %v141_v36, %v140_v35  ;;  %v492_v38 = vld [vmem:[#allocation7] sm:$0xff]  ;;  %v875_v43 = vpack.c.bf16 %v495_v42, %v494_v40  ;;  %v497_v45 = vld [vmem:[#allocation7 + $0x28] sm:$0xff]  ;;  %v498_v47 = vld [vmem:[#allocation7 + $0x30] sm:$0xff] }
  0x59   :  { %868 = vmatprep.subr.bf16.mxu1 %v1007_v62  ;;  %276 = vmatmul.mubr.f32.vlgmr.msra.gmra.mrb[0].mxu0 %v176_v23  ;;  %v136_v23 = vld [vmem:[#allocation5 + $0x250] sm:$0xff]  ;;  %v872_v41 = vpack.c.bf16 %v493_v39, %v492_v38  ;;  %v499_v48 = vld [vmem:[#allocation7 + $0x38] sm:$0xff]  ;;  %v502_v53 = vld [vmem:[#allocation7 + $0x50] sm:$0xff] }
  0x5a   :  { %839 = vmatpush3.bf16.msra.mxu0 %v838_v51  ;;  %415 = vmatprep.mubr.f32.mxu0 %v201_v0  ;;  %v858_v27 = vpack.c.bf16 %v137_v24, %v136_v23  ;;  %v496_v44 = vld [vmem:[#allocation7 + $0x20] sm:$0xff]  ;;  %v881_v49 = vpack.c.bf16 %v499_v48, %v498_v47  ;;  %v501_v51 = vld [vmem:[#allocation7 + $0x48] sm:$0xff]  ;;  %v506_v59 = vld [vmem:[#allocation7 + $0x70] sm:$0xff] }
  0x5b   :  { %346 = vmatmul.mubr.f32.vlgmr.msra.gmra.mrb[0].mxu1 %v183_v32  ;;  %841 = vmatprep.subr.bf16.mxu0 %v840_v54  ;;  %v157_v32 = vld [vmem:[#allocation5 + $0x2f8] sm:$0xff]  ;;  %v878_v46 = vpack.c.bf16 %v497_v45, %v496_v44  ;;  %v500_v50 = vld [vmem:[#allocation7 + $0x40] sm:$0xff]  ;;  %v503_v54 = vld [vmem:[#allocation7 + $0x58] sm:$0xff] }
  0x5c   :  { %870 = vmatpush3.bf16.msra.mxu1 %v869_v63  ;;  %734 = vmatprep.mubr.msk.f32.mxu1 %vm1008_vm0, %v1009_v8  ;;  %v864_v34 = vpack.c.bf16 %v157_v32, %v156_v31  ;;  %v884_v52 = vpack.c.bf16 %v501_v51, %v500_v50  ;;  %v887_v55 = vpack.c.bf16 %v503_v54, %v502_v53  ;;  %v504_v56 = vld [vmem:[#allocation7 + $0x60] sm:$0xff]  ;;  %v505_v57 = vld [vmem:[#allocation7 + $0x68] sm:$0xff]  ;;  %v507_v60 = vld [vmem:[#allocation7 + $0x78] sm:$0xff] }
  0x5d   :  { %871 = vmatprep.subr.bf16.mxu1 %v1007_v62  ;;  %v893_v61 = vpack.c.bf16 %v507_v60, %v506_v59  ;;  %v602_v0 = vld [vmem:[%s1123_s2] ss:$0 sm:$0xff]  ;;  %s1010_s2 = smov [#allocation8]  }
  0x5e   :  { %843 = vmatpush3.bf16.msra.mxu0 %v842_v1  ;;  %s592_s7 = sshll.u32 %s1010_s2, 4  ;;  %s593_s7 = int_to_ptr.vmem [resolvable:$true] %s592_s7 }
  0x5f   :  { %845 = vmatprep.subr.bf16.mxu0 %v844_v2  ;;  %735 = vmatmul.mubr.msk.f32.vlgmr.msra.gmra.mrb[2].mxu1 %vm208_vm1, %v200_v5  ;;  %s973_s8 = scalar_lea.vmem %s593_s7, 32  ;;  %p978_p11 = scmp.lt.s32.totalorder %s593_s7, %s593_s7 }
  0x60   :  { %769 = vmatprep.mubr.msk.f32.mxu1 %vm1008_vm0, %v1009_v8  ;;  %873 = vmatpush3.bf16.msra.mxu1 %v872_v41  ;;  %p974_p10 = scmp.ne.s32.totalorder %s593_s7, %s973_s8  ;;  %p979_p12 = scmp.lt.s32.totalorder %s973_s8, %s973_s8 }
  0x61   :  { %874 = vmatprep.subr.bf16.mxu1 %v1007_v62 }
  0x62   :  { %847 = vmatpush3.bf16.msra.mxu0 %v846_v9  ;;  %p980_p13 = por %p979_p12, %p978_p11 }
  0x63   :  { %849 = vmatprep.subr.bf16.mxu0 %v848_v11 }
  0x64   :  { %876 = vmatpush3.bf16.msra.mxu1 %v875_v43  ;;  %p981_p0 = pnand %p980_p13, %p974_p10 }
  0x65   :  { %877 = vmatprep.subr.bf16.mxu1 %v1007_v62 }
  0x66   :  { %851 = vmatpush3.bf16.msra.mxu0 %v850_v10  ;;  %v604_v10 = vld [vmem:[%s1125_s4] ss:$0 sm:$0xff] }
  0x67   :  { %853 = vmatprep.subr.bf16.mxu0 %v852_v16 }
  0x68   :  { %879 = vmatpush3.bf16.msra.mxu1 %v878_v46 }
  0x69   :  { %880 = vmatprep.subr.bf16.mxu1 %v1007_v62 }
  0x6a   :  { %855 = vmatpush3.bf16.msra.mxu0 %v854_v21 }
  0x6b   :  { %857 = vmatprep.subr.bf16.mxu0 %v856_v22 }
  0x6c   :  { %882 = vmatpush3.bf16.msra.mxu1 %v881_v49 }
  0x6d   :  { %883 = vmatprep.subr.bf16.mxu1 %v1007_v62 }
  0x6e   :  { %859 = vmatpush3.bf16.msra.mxu0 %v858_v27 }
  0x6f   :  { %861 = vmatprep.subr.bf16.mxu0 %v860_v28 }
  0x70   :  { %885 = vmatpush3.bf16.msra.mxu1 %v884_v52 }
  0x71   :  { %886 = vmatprep.subr.bf16.mxu1 %v1007_v62 }
  0x72   :  { %863 = vmatpush3.bf16.msra.mxu0 %v862_v33 }
  0x73   :  { %865 = vmatprep.subr.bf16.mxu0 %v864_v34 }
  0x74   :  { %888 = vmatpush3.bf16.msra.mxu1 %v887_v55 }
  0x75   :  { %889 = vmatprep.subr.bf16.mxu1 %v1007_v62 }
  0x76   :  { %867 = vmatpush3.bf16.msra.mxu0 %v866_v37 }
  0x79   :  { %416 = vmatmul.mubr.f32.vlgmr.msra.gmra.mrb[2].mxu0 %v1088_v58  ;;  %v890_v58 = vpack.c.bf16 %v505_v57, %v504_v56 }
  0x7b   :  { %891 = vmatpush3.bf16.msra.mxu1 %v890_v58 }
  0x7c   :  { %892 = vmatprep.subr.bf16.mxu1 %v1007_v62 }
  0x7f   :  { %894 = vmatpush3.bf16.msra.mxu1 %v893_v61 }
 0x12c   :  { %v637_v63 = vpop.f32.mrb[0].mxu0 }
 0x12d   :  { %v638_v1 = vpop.f32.mrb[1].mxu0 }
 0x12e   :  { %v672_v2 = vpop.f32.mrb[0].mxu1  ;;  %v639_v3 = vadd.f32 %v638_v1, %v637_v63 }
 0x12f   :  { %v673_v4 = vpop.f32.mrb[1].mxu1 }
 0x130   :  { %v674_v5 = vadd.f32 %v673_v4, %v672_v2  ;;  %v278_v6 = vadd.f32 %v639_v3, %v602_v0 }
 0x132   :  { %v348_v7 = vadd.f32 %v674_v5, %v278_v6  ;;  %v487_v8 = vpop.f32.mrb[2].mxu1 }
 0x133   :  { %v736_v9 = vpop.f32.mrb[3].mxu1 }
 0x14c   :  { %v707_v11 = vpop.f32.mrb[2].mxu0 }
 0x14d   :  { %v708_v62 = vpop.f32.mrb[3].mxu0 }
 0x14e   :  { %v709_v12 = vadd.f32 %v708_v62, %v707_v11 }
 0x150   :  { %v418_v13 = vadd.f32 %v709_v12, %v348_v7 }
 0x152   :  { %v488_v14 = vadd.f32 %v487_v8, %v418_v13 }
 0x154   :  { %v491_v15 = vmax.f32 %v488_v14, 0.0 }
 0x156   :  { %770 = vmatmul.mubr.f32.vlgmr.msra.gmra.mrb[4].mxu1 %v491_v15 }
 0x229   :  { %v581_v16 = vpop.f32.mrb[4].mxu1 }
 0x22a   :  { %v582_v17 = vadd.f32 %v604_v10, %v581_v16  ;;  %v771_v18 = vpop.f32.mrb[5].mxu1 }
 0x22c   :  { %585 = vst [vmem:[#allocation8] sm:$0x3] %v582_v17 }
 0x22d   :  { %984 = shalt.err (!%p981_p0)
}
 0x22e   :  { %s985_s11 = scalar_lea.hbm %s1126_s5, 32 }
 0x22f   :  { %p986_p1 = scmp.ne.s32.totalorder %s1126_s5, %s985_s11  ;;  %p989_p2 = scmp.lt.u32.totalorder %s985_s11, %s1126_s5 }
 0x231   :  { %p991_p3 = pnand %p989_p2, %p986_p1 }
 0x233   :  { %994 = shalt.err (!%p991_p3)
}
 0x234   :  { %595 = dma.vmem_to_hbm [thread:$0]  %s593_s7, 32, %s1126_s5, [#allocation4]  }
 0x235   :  { %999 = dma.done.wait [#allocation4], 32  }
 0x236   :  { %1000 = vsyncadd [#allocation4], 4294967264 }
 0x237   :  { %599 = vsyncpa [#allocation3], 1 }
 0x238   :  { %600 = vsyncpa [#allocation6], 1 }
 0x239   :  { %601 = vsyncpa [#allocation4], 1 }

</bundles_post_ra>
